<compile_context>
chip_gen: v7x
topology: tpu7x:2x2x1
jax: 0.10.0
libtpu: 0.0.40
codegen_flags: <defaults>
</compile_context>

<pallas_src>
import functools

import jax
import jax.numpy as jnp
from jax import lax
from jax.experimental import pallas as pl
from jax.experimental.pallas import tpu as pltpu


def _round_up(x, m):
    return ((x + m - 1) // m) * m


def _largest_divisor_tile(dim, align, target):
    """Largest multiple of `align` that divides `dim` and is <= target.

    `dim` is already a multiple of `align`, so the result is always valid.
    """
    best = align
    t = align
    limit = min(target, dim)
    while t <= limit:
        if dim % t == 0:
            best = t
        t += align
    return best


def _tpu_generation_config():
    """Per-TPU-generation VMEM budget / tile targets (with safe fallbacks)."""
    phys_vmem = 128 * 1024 * 1024
    try:
        info = pltpu.get_tpu_info()
        phys_vmem = int(getattr(info, "vmem_capacity_bytes", phys_vmem))
    except Exception:
        pass
    if phys_vmem <= 96 * 1024 * 1024:
        # v7x-like: 64 MiB per TensorCore, 2 TCs/chip -> leave headroom and
        # make sure a 'parallel' grid axis has >= 2 blocks.
        return {"vmem_budget": 48 * 1024 * 1024, "two_cores": True,
                "tm_target": 512, "tn_target": 768, "tk_target": 512}
    # v5e/v6e-like: 128 MiB VMEM, single TC -> big tiles to cut HBM re-reads.
    return {"vmem_budget": 100 * 1024 * 1024, "two_cores": False,
            "tm_target": 1024, "tn_target": 1024, "tk_target": 512}


# --------------------------------------------------------------------------
# Kernels
# --------------------------------------------------------------------------
def _linear_tiled_kernel(x_ref, w_ref, *rest, has_bias):
    # x:(tm,tk)  w:(tk,tn)  [b:(1,tn)]  o:(tm,tn)  acc:(tm,tn) f32
    if has_bias:
        b_ref, o_ref, acc_ref = rest
    else:
        o_ref, acc_ref = rest

    @pl.when(pl.program_id(2) == 0)
    def _init():
        acc_ref[...] = jnp.zeros_like(acc_ref)

    acc_ref[...] += jnp.dot(x_ref[...], w_ref[...],
                            preferred_element_type=jnp.float32)

    @pl.when(pl.program_id(2) == pl.num_programs(2) - 1)
    def _store():
        r = acc_ref[...]
        if has_bias:
            r = r + b_ref[...]
        o_ref[...] = r.astype(o_ref.dtype)


def _linear_smallm_kernel(x_ref, w_ref, *rest, has_bias, tk):
    # Small-M fast path: x (Mp,Kp) is resident in VMEM; 2-D grid (N, K).
    # x:(Mp,Kp)  w:(tk,tn)  [b:(1,tn)]  o:(Mp,tn)  acc:(Mp,tn) f32
    if has_bias:
        b_ref, o_ref, acc_ref = rest
    else:
        o_ref, acc_ref = rest
    k = pl.program_id(1)

    @pl.when(k == 0)
    def _init():
        acc_ref[...] = jnp.zeros_like(acc_ref)

    xk = x_ref[:, pl.ds(pl.multiple_of(k * tk, 128), tk)]
    acc_ref[...] += jnp.dot(xk, w_ref[...], preferred_element_type=jnp.float32)

    @pl.when(k == pl.num_programs(1) - 1)
    def _store():
        r = acc_ref[...]
        if has_bias:
            r = r + b_ref[...]
        o_ref[...] = r.astype(o_ref.dtype)


# --------------------------------------------------------------------------
# Wrapper
# --------------------------------------------------------------------------
@functools.partial(
    jax.jit,
    static_argnames=("n_out", "has_bias", "block_m", "block_n", "block_k"))
def linear_forward(x, weight_t, bias2d=None, *, n_out, has_bias,
                   block_m=None, block_n=None, block_k=None):
    """Pallas equivalent of nn.Linear.forward.

    x:        (..., K) float32
    weight_t: (Kp, Np) float32 -- weight already transposed and zero-padded to
              lane-aligned (128-multiple) Kp/Np at module init.
    bias2d:   (1, Np) float32 (pre-padded) or None
    n_out:    logical output size N (<= Np)
    """
    *lead, K = x.shape
    Kp, Np = weight_t.shape
    if Kp < K or Kp % 128 or Np % 128 or Np < n_out:
        raise ValueError("weight_t must be pre-padded (Kp,Np) with 128-aligned dims")

    M = 1
    for d in lead:
        M *= d

    cfg = _tpu_generation_config()
    budget = cfg["vmem_budget"]

    # Alignment-only padding of x: sublane (8) on M, lane (128) on K.
    Mp = _round_up(max(M, 1), 8)
    x2d = x.reshape(M, K)
    if (Mp, Kp) != (M, K):
        x2d = jnp.pad(x2d, ((0, Mp - M), (0, Kp - K)))

    # Tile sizes: largest aligned divisors of the padded dims (<= targets).
    tm = block_m if block_m is not None else _largest_divisor_tile(Mp, 8, cfg["tm_target"])
    tn = block_n if block_n is not None else _largest_divisor_tile(Np, 128, cfg["tn_target"])
    tk = block_k if block_k is not None else _largest_divisor_tile(Kp, 128, cfg["tk_target"])

    # Validate user-supplied blocks (divisibility + hardware alignment).
    for name, t, pad, align in (("block_m", tm, Mp, 8),
                                ("block_n", tn, Np, 128),
                                ("block_k", tk, Kp, 128)):
        if pad % t != 0:
            raise ValueError(f"{name}={t} must divide padded dim {pad}")
        if t % align != 0 and t != pad:
            raise ValueError(f"{name}={t} must be a multiple of {align}")

    # v7x: make sure at least one 'parallel' axis has >= 2 blocks for the 2 TCs.
    if cfg["two_cores"] and block_m is None and block_n is None:
        if (Mp // tm) * (Np // tn) < 2:
            if Np >= 256:
                tn = _largest_divisor_tile(Np, 128, Np // 2)
            elif Mp >= 16:
                tm = _largest_divisor_tile(Mp, 8, Mp // 2)

    # Small-M (decode-like) fast path: whole x resident in VMEM, 2-D grid.
    use_smallm = (block_m is None and Mp <= 256
                  and 2 * Mp * Kp * 4 <= budget // 4)

    if use_smallm:
        footprint = 4 * (2 * Mp * Kp + 2 * tk * tn + 3 * Mp * tn + 2 * tn)
    else:
        footprint = 4 * (2 * tm * tk + 2 * tk * tn + 3 * tm * tn + 2 * tn)
    if footprint > budget:
        raise ValueError(
            f"Tile sizes (tm={tm}, tn={tn}, tk={tk}) need ~{footprint >> 20} MiB "
            f"of VMEM, exceeding this generation's budget of {budget >> 20} MiB")

    out_shape = jax.ShapeDtypeStruct((Mp, Np), x.dtype)
    b_args = (bias2d,) if has_bias else ()

    if use_smallm:
        grid = (Np // tn, Kp // tk)
        x_spec = pl.BlockSpec((Mp, Kp), lambda j, k: (0, 0))   # resident
        w_spec = pl.BlockSpec((tk, tn), lambda j, k: (k, j))
        o_spec = pl.BlockSpec((Mp, tn), lambda j, k: (0, j))
        b_spec = pl.BlockSpec((1, tn), lambda j, k: (0, j))
        scratch = [pltpu.VMEM((Mp, tn), jnp.float32)]
        dims = ("parallel", "arbitrary")
        kernel = functools.partial(_linear_smallm_kernel,
                                   has_bias=has_bias, tk=tk)
    else:
        grid = (Mp // tm, Np // tn, Kp // tk)
        x_spec = pl.BlockSpec((tm, tk), lambda i, j, k: (i, k))
        w_spec = pl.BlockSpec((tk, tn), lambda i, j, k: (k, j))
        o_spec = pl.BlockSpec((tm, tn), lambda i, j, k: (i, j))
        b_spec = pl.BlockSpec((1, tn), lambda i, j, k: (0, j))
        scratch = [pltpu.VMEM((tm, tn), jnp.float32)]
        dims = ("parallel", "parallel", "arbitrary")
        kernel = functools.partial(_linear_tiled_kernel, has_bias=has_bias)

    in_specs = [x_spec, w_spec] + ([b_spec] if has_bias else [])

    vmem_limit = int(min(budget, max(footprint + (4 << 20), 32 * 1024 * 1024)))

    out = pl.pallas_call(
        kernel,
        out_shape=out_shape,
        grid_spec=pltpu.PrefetchScalarGridSpec(
            num_scalar_prefetch=0,
            grid=grid,
            in_specs=in_specs,
            out_specs=o_spec,
            scratch_shapes=scratch,
        ),
        compiler_params=pltpu.CompilerParams(
            dimension_semantics=dims,
            vmem_limit_bytes=vmem_limit,
        ),
        cost_estimate=pl.CostEstimate(
            flops=2 * M * n_out * K,
            transcendentals=0,
            bytes_accessed=4 * (M * K + n_out * K + M * n_out),
        ),
    )(x2d, weight_t, *b_args)

    if (Mp, Np) != (M, n_out):
        out = out[:M, :n_out]
    return out.reshape(*lead, n_out)


class PallasLinear:
    """Mirror of the PyTorch `Linear` module using the Pallas kernel."""

    def __init__(self, input_size, output_size, args=None, seqlength=1, key=None):
        if key is None:
            key = jax.random.PRNGKey(0)
        kw, kb = jax.random.split(key)
        # Deterministic init mimicking nn.Linear's uniform(-1/sqrt(K), 1/sqrt(K)).
        bound = 1.0 / (input_size ** 0.5)
        w_nk = jax.random.uniform(
            kw, (output_size, input_size), jnp.float32, -bound, bound)
        self.weight = w_nk                      # PyTorch (N, K) layout (reference)
        # One-time transpose + pad to (Kp, Np): no per-call weight transpose/pad.
        Kp = _round_up(input_size, 128)
        Np = _round_up(output_size, 128)
        self.weight_t = jnp.pad(
            w_nk.T, ((0, Kp - input_size), (0, Np - output_size)))
        self.n_out = output_size
        self.has_bias = not (args is not None and args.get("pos", False))
        if self.has_bias:
            b = jax.random.uniform(kb, (output_size,), jnp.float32, -bound, bound)
            self.bias = b
            self.bias2d = jnp.pad(
                b.reshape(1, output_size), ((0, 0), (0, Np - output_size)))
        else:
            self.bias = None
            self.bias2d = None

    def __call__(self, x, position_index=False, **tile_kwargs):
        return linear_forward(
            x, self.weight_t, self.bias2d,
            n_out=self.n_out, has_bias=self.has_bias, **tile_kwargs)


if __name__ == "__main__":
    key = jax.random.PRNGKey(0)
    k_x1, k_x2, k_x3, k_m1, k_m2, k_m3, k_m4 = jax.random.split(key, 7)

    # ---- Case 1: args['pos'] == False -> bias present (small demo shapes) ----
    batch, seq, input_size, output_size = 2, 8, 32, 64
    x = jax.random.normal(k_x1, (batch, seq, input_size), jnp.float32)

    mod_bias = PallasLinear(input_size, output_size, args={"pos": False}, key=k_m1)
    y_bias = mod_bias(x)
    jax.block_until_ready(y_bias)
    ref_bias = (
        jnp.dot(x, mod_bias.weight.T, precision=lax.Precision.HIGHEST)
        + mod_bias.bias
    )
    assert y_bias.shape == (batch, seq, output_size)
    assert jnp.allclose(y_bias, ref_bias, atol=2e-4, rtol=2e-4)

    # ---- Case 2: args['pos'] == True -> no bias ----
    mod_nobias = PallasLinear(input_size, output_size, args={"pos": True}, key=k_m2)
    y_nobias = mod_nobias(x)
    jax.block_until_ready(y_nobias)
    ref_nobias = jnp.dot(x, mod_nobias.weight.T, precision=lax.Precision.HIGHEST)
    assert y_nobias.shape == (batch, seq, output_size)
    assert jnp.allclose(y_nobias, ref_nobias, atol=2e-4, rtol=2e-4)

    # ---- Case 3: force the 3-D (M,N,K)-tiled grid (block_m given) to exercise
    #      the K-reduction accumulator + bias epilogue (grid = (2, 3, 2)) ----
    in2, out2 = 256, 384
    x2 = jax.random.normal(k_x2, (batch, seq, in2), jnp.float32)
    mod_tiled = PallasLinear(in2, out2, args={"pos": False}, key=k_m3)
    y_tiled = mod_tiled(x2, block_m=8, block_n=128, block_k=128)
    jax.block_until_ready(y_tiled)
    ref_tiled = (
        jnp.dot(x2, mod_tiled.weight.T, precision=lax.Precision.HIGHEST)
        + mod_tiled.bias
    )
    assert y_tiled.shape == (batch, seq, out2)
    assert jnp.allclose(y_tiled, ref_tiled, atol=2e-4, rtol=2e-4)

    # ---- Case 4: small-M resident-x fast path with a multi-step K reduction
    #      (2-D grid (N/tn, K/tk) = (2, 2), x stays in VMEM) ----
    in3, out3 = 256, 256
    x3 = jax.random.normal(k_x3, (batch, seq, in3), jnp.float32)
    mod_small = PallasLinear(in3, out3, args={"pos": False}, key=k_m4)
    y_small = mod_small(x3, block_n=128, block_k=128)
    jax.block_until_ready(y_small)
    ref_small = (
        jnp.dot(x3, mod_small.weight.T, precision=lax.Precision.HIGHEST)
        + mod_small.bias
    )
    assert y_small.shape == (batch, seq, out3)
    assert jnp.allclose(y_small, ref_small, atol=2e-4, rtol=2e-4)

    print("KERNEL_OK")
</pallas_src>

<mosaic_0001>
module attributes {stable_mosaic.version = 11 : i64} {
  func.func @_linear_smallm_kernel(%arg0: i32, %arg1: i32, %arg2: memref<16x128xf32, #tpu.memory_space<vmem>>, %arg3: memref<128x128xf32, #tpu.memory_space<vmem>>, %arg4: memref<1x128xf32, #tpu.memory_space<vmem>>, %arg5: memref<16x128xf32, #tpu.memory_space<vmem>>, %arg6: memref<16x128xf32, #tpu.memory_space<vmem>>) attributes {dimension_semantics = [#tpu.dimension_semantics<parallel>, #tpu.dimension_semantics<arbitrary>], iteration_bounds = array<i64: 1, 1>, scalar_prefetch = 0 : i64, scratch_operands = 1 : i64, tpu.core_type = #tpu.core_type<tc>, window_params = [{pipeline_mode = #tpu.pipeline_mode<synchronous>, transform_indices = @transform_0, window_bounds = array<i64: 16, 128>}, {transform_indices = @transform_1, window_bounds = array<i64: 128, 128>}, {transform_indices = @transform_2, window_bounds = array<i64: 1, 128>}, {transform_indices = @transform_3, window_bounds = array<i64: 16, 128>}]} {
    %c0_i32 = arith.constant 0 : i32
    %0 = arith.cmpi eq, %arg1, %c0_i32 : i32
    %1 = arith.extui %0 : i1 to i32
    %c0_i32_0 = arith.constant 0 : i32
    %2 = arith.cmpi ne, %1, %c0_i32_0 : i32
    scf.if %2 {
      %cst_9 = arith.constant 0.000000e+00 : f32
      %15 = vector.broadcast %cst_9 : f32 to vector<16x128xf32>
      %c0_10 = arith.constant 0 : index
      %c0_11 = arith.constant 0 : index
      %16 = vector.load %arg6[%c0_10, %c0_11] : memref<16x128xf32, #tpu.memory_space<vmem>>, vector<16x128xf32>
      tpu.vector_store %arg6[%c0_10, %c0_11], %15 {strides = array<i32>} : memref<16x128xf32, #tpu.memory_space<vmem>>, vector<16x128xf32>,
    } else {
    }
    %c128_i32 = arith.constant 128 : i32
    %3 = arith.muli %arg1, %c128_i32 : i32
    %4 = tpu.assume_multiple %3, 128 : i32
    %c0 = arith.constant 0 : index
    %5 = arith.index_cast %4 : i32 to index
    %6 = vector.load %arg2[%c0, %5] : memref<16x128xf32, #tpu.memory_space<vmem>>, vector<16x128xf32>
    %c0_1 = arith.constant 0 : index
    %c0_2 = arith.constant 0 : index
    %7 = vector.load %arg6[%c0_1, %c0_2] : memref<16x128xf32, #tpu.memory_space<vmem>>, vector<16x128xf32>
    %c0_3 = arith.constant 0 : index
    %c0_4 = arith.constant 0 : index
    %8 = vector.load %arg3[%c0_3, %c0_4] : memref<128x128xf32, #tpu.memory_space<vmem>>, vector<128x128xf32>
    %cst = arith.constant dense<0.000000e+00> : vector<16x128xf32>
    %9 = tpu.matmul %6, %8, %cst {dimension_numbers = #tpu.dot_dimension_numbers<[1], [0], [0], [1], [0, 0, 1, 1], [], []>} : vector<16x128xf32>, vector<128x128xf32>, vector<16x128xf32> -> vector<16x128xf32>
    %10 = arith.addf %7, %9 : vector<16x128xf32>
    %c0_5 = arith.constant 0 : index
    %c0_6 = arith.constant 0 : index
    %11 = vector.load %arg6[%c0_5, %c0_6] : memref<16x128xf32, #tpu.memory_space<vmem>>, vector<16x128xf32>
    tpu.vector_store %arg6[%c0_5, %c0_6], %10 {strides = array<i32>} : memref<16x128xf32, #tpu.memory_space<vmem>>, vector<16x128xf32>,
    %c0_i32_7 = arith.constant 0 : i32
    %12 = arith.cmpi eq, %arg1, %c0_i32_7 : i32
    %13 = arith.extui %12 : i1 to i32
    %c0_i32_8 = arith.constant 0 : i32
    %14 = arith.cmpi ne, %13, %c0_i32_8 : i32
    scf.if %14 {
      %c0_9 = arith.constant 0 : index
      %c0_10 = arith.constant 0 : index
      %15 = vector.load %arg6[%c0_9, %c0_10] : memref<16x128xf32, #tpu.memory_space<vmem>>, vector<16x128xf32>
      %c0_11 = arith.constant 0 : index
      %c0_12 = arith.constant 0 : index
      %16 = vector.load %arg4[%c0_11, %c0_12] : memref<1x128xf32, #tpu.memory_space<vmem>>, vector<1x128xf32>
      %17 = vector.broadcast %16 : vector<1x128xf32> to vector<16x128xf32>
      %18 = arith.addf %15, %17 : vector<16x128xf32>
      %c0_13 = arith.constant 0 : index
      %c0_14 = arith.constant 0 : index
      %19 = vector.load %arg5[%c0_13, %c0_14] : memref<16x128xf32, #tpu.memory_space<vmem>>, vector<16x128xf32>
      tpu.vector_store %arg5[%c0_13, %c0_14], %18 {strides = array<i32>} : memref<16x128xf32, #tpu.memory_space<vmem>>, vector<16x128xf32>,
    } else {
    }
    return
  }
  func.func @transform_0(%arg0: i32, %arg1: i32) -> (i32, i32) {
    %c0_i32 = arith.constant 0 : i32
    %c0_i32_0 = arith.constant 0 : i32
    %c0_i32_1 = arith.constant 0 : i32
    return %c0_i32, %c0_i32_0 : i32, i32
  }
  func.func @transform_1(%arg0: i32, %arg1: i32) -> (i32, i32) {
    %c0_i32 = arith.constant 0 : i32
    return %arg1, %arg0 : i32, i32
  }
  func.func @transform_2(%arg0: i32, %arg1: i32) -> (i32, i32) {
    %c0_i32 = arith.constant 0 : i32
    %c0_i32_0 = arith.constant 0 : i32
    return %c0_i32, %arg0 : i32, i32
  }
  func.func @transform_3(%arg0: i32, %arg1: i32) -> (i32, i32) {
    %c0_i32 = arith.constant 0 : i32
    %c0_i32_0 = arith.constant 0 : i32
    return %c0_i32, %arg0 : i32, i32
  }
}

</mosaic_0001>

<bundles_post_ra>
// kernel: linear_forward.1
= control target key start
LH: loop header
LB: loop body
LE: loop exit
PB: predicated region body
PF: predicated region fallthrough
CT: control target
= control target key end

     0   :  { %8 = vsyncpa [#allocation4], 0  ;;  %s272_s12 = smov [#allocation3]   ;;  %s322_s0 = inlined_call_operand.vmem [shape: f32[16,128], index: 0, kind: input, shape index: {}]   ;;  %s323_s1 = inlined_call_operand.hbm [shape: f32[128,128], index: 1, kind: input, shape index: {}]   ;;  %s324_s2 = inlined_call_operand.vmem [shape: f32[1,128], index: 2, kind: input, shape index: {}]   ;;  %s325_s3 = inlined_call_operand.vmem [shape: f32[16,128], index: 3, kind: output, shape index: {}]  }
   0x1   :  { %s16_s13 = sshll.u32 %s272_s12, 4  ;;  %s248_s16 = scalar_lea.hbm %s323_s1, 2048  ;;  %s17_s13 = int_to_ptr.vmem [resolvable:$true] %s16_s13 }
   0x2   :  { %p249_p0 = scmp.ne.s32.totalorder %s323_s1, %s248_s16  ;;  %p252_p1 = scmp.lt.u32.totalorder %s248_s16, %s323_s1 }
   0x4   :  { %p254_p2 = pnand %p252_p1, %p249_p0 }
   0x6   :  { %257 = shalt.err (!%p254_p2)
}
   0x7   :  { %s258_s21 = scalar_lea.vmem %s17_s13, 2048  ;;  %p263_p4 = scmp.lt.s32.totalorder %s17_s13, %s17_s13 }
   0x8   :  { %p259_p3 = scmp.ne.s32.totalorder %s17_s13, %s258_s21  ;;  %p264_p5 = scmp.lt.s32.totalorder %s258_s21, %s258_s21 }
   0xa   :  { %p265_p6 = por %p264_p5, %p263_p4 }
   0xc   :  { %p266_p7 = pnand %p265_p6, %p259_p3 }
   0xe   :  { %269 = shalt.err (!%p266_p7)
}
   0xf   :  { %s273_s22 = smov 128   ;;  %s274_s23 = smov 8  }
  0x10   :  { %22 = dma.hbm_to_vmem [thread:$0]  %s323_s1, 2048, %s17_s13, [#allocation4], %s273_s22, %s273_s22, %s274_s23  }
  0x11   :  { %270 = dma.done.wait [#allocation4], 2048  }
  0x12   :  { %271 = vsyncadd [#allocation4], 4294965248  ;;  %v42_v0 = vld [vmem:[#allocation3] sm:$0xff]  ;;  %v43_v1 = vld [vmem:[#allocation3 + $0x8] sm:$0xff] }
  0x13   :  { %v44_v2 = vld [vmem:[#allocation3 + $0x10] sm:$0xff]  ;;  %v213_v3 = vpack.c.bf16 %v43_v1, %v42_v0  ;;  %v45_v4 = vld [vmem:[#allocation3 + $0x18] sm:$0xff]  ;;  %v46_v6 = vld [vmem:[#allocation3 + $0x20] sm:$0xff] }
  0x14   :  { %v217_v5 = vpack.c.bf16 %v45_v4, %v44_v2  ;;  %v47_v7 = vld [vmem:[#allocation3 + $0x28] sm:$0xff]  ;;  %v38_v9 = vld [vmem:[%s322_s0] sm:$0xff]  ;;  %v48_v10 = vld [vmem:[#allocation3 + $0x30] sm:$0xff] }
  0x15   :  { %214 = vmatprep.subr.bf16.mxu0 %v213_v3  ;;  %v221_v8 = vpack.c.bf16 %v47_v7, %v46_v6  ;;  %v49_v11 = vld [vmem:[#allocation3 + $0x38] sm:$0xff]  ;;  %210 = vmatprep.mubr.f32.mxu0 %v38_v9  ;;  %v50_v13 = vld [vmem:[#allocation3 + $0x40] sm:$0xff]  ;;  %v51_v14 = vld [vmem:[#allocation3 + $0x48] sm:$0xff] }
  0x16   :  { %216 = vmatpush3.bf16.msra.mxu0 %v213_v3  ;;  %v225_v12 = vpack.c.bf16 %v49_v11, %v48_v10  ;;  %v229_v15 = vpack.c.bf16 %v51_v14, %v50_v13  ;;  %v52_v16 = vld [vmem:[#allocation3 + $0x50] sm:$0xff]  ;;  %v53_v17 = vld [vmem:[#allocation3 + $0x58] sm:$0xff]  ;;  %v54_v19 = vld [vmem:[#allocation3 + $0x60] sm:$0xff] }
  0x17   :  { %218 = vmatprep.subr.bf16.mxu0 %v217_v5  ;;  %v233_v18 = vpack.c.bf16 %v53_v17, %v52_v16  ;;  %v55_v20 = vld [vmem:[#allocation3 + $0x68] sm:$0xff]  ;;  %v56_v22 = vld [vmem:[#allocation3 + $0x70] sm:$0xff]  ;;  %v57_v23 = vld [vmem:[#allocation3 + $0x78] sm:$0xff] }
  0x18   :  { %v237_v21 = vpack.c.bf16 %v55_v20, %v54_v19  ;;  %v241_v24 = vpack.c.bf16 %v57_v23, %v56_v22  ;;  %v39_v25 = vld [vmem:[%s322_s0 + $0x8] sm:$0xff]  ;;  %v159_v26 = vld [vmem:[%s324_s2] ss:$0 sm:$0xff] }
  0x1a   :  { %220 = vmatpush3.bf16.msra.mxu0 %v217_v5 }
  0x1b   :  { %222 = vmatprep.subr.bf16.mxu0 %v221_v8 }
  0x1e   :  { %224 = vmatpush3.bf16.msra.mxu0 %v221_v8 }
  0x1f   :  { %226 = vmatprep.subr.bf16.mxu0 %v225_v12 }
  0x22   :  { %228 = vmatpush3.bf16.msra.mxu0 %v225_v12 }
  0x23   :  { %230 = vmatprep.subr.bf16.mxu0 %v229_v15 }
  0x26   :  { %232 = vmatpush3.bf16.msra.mxu0 %v229_v15 }
  0x27   :  { %234 = vmatprep.subr.bf16.mxu0 %v233_v18 }
  0x2a   :  { %236 = vmatpush3.bf16.msra.mxu0 %v233_v18 }
  0x2b   :  { %238 = vmatprep.subr.bf16.mxu0 %v237_v21 }
  0x2e   :  { %240 = vmatpush3.bf16.msra.mxu0 %v237_v21 }
  0x2f   :  { %242 = vmatprep.subr.bf16.mxu0 %v241_v24 }
  0x32   :  { %244 = vmatpush3.bf16.msra.mxu0 %v241_v24 }
  0x35   :  { %211 = vmatmul.mubr.f32.vlgmr.msra.gmra.mrb[0].mxu0 %v39_v25 }
 0x108   :  { %v212_v27 = vpop.f32.mrb[0].mxu0 }
 0x109   :  { %v150_v28 = vadd.f32 %v212_v27, %v159_v26  ;;  %v124_v29 = vpop.f32.mrb[1].mxu0 }
 0x10a   :  { %v149_v30 = vadd.f32 %v159_v26, %v124_v29 }
 0x10b   :  { %152 = vst [vmem:[%s325_s3 + $0x8] sm:$0xff] %v150_v28 }
 0x10c   :  { %151 = vst [vmem:[%s325_s3] sm:$0xff] %v149_v30 }
 0x10d   :  { %157 = vsyncpa [#allocation4], 1 }

</bundles_post_ra>
